<compile_context>
chip_gen: v7x
topology: tpu7x:2x2x1
jax: 0.10.0
libtpu: 0.0.40
codegen_flags: <defaults>
</compile_context>

<pallas_src>
import functools

import jax
import jax.numpy as jnp
from jax import lax
from jax.experimental import pallas as pl
from jax.experimental.pallas import tpu as pltpu


# ----------------------------- kernels ------------------------------------ #

def fused_forward_kernel(x_ref, w_ref, out_ref, *, bb, use_skip, compute_dtype):
    """No-ReEig path: full forward fused, intermediates stay in VMEM/vregs."""
    w = w_ref[...]                                   # (H, N), compute_dtype
    for b in range(bb):                              # small static unroll
        x = x_ref[b]                                 # (N, N), compute_dtype
        # Z^T[h, j] = sum_n W[h, n] x[j, n]   (== (x @ W^T)^T, any x)
        zt = lax.dot_general(w, x, (((1,), (1,)), ((), ())),
                             preferred_element_type=jnp.float32)       # (H, N) f32
        # C[i, j] = sum_n Z^T[i, n] W[j, n]   (== Z^T @ W^T)
        c = lax.dot_general(zt.astype(compute_dtype), w,
                            (((1,), (1,)), ((), ())),
                            preferred_element_type=jnp.float32)        # (H, H) f32
        # D1 = C @ W
        d1 = lax.dot_general(c.astype(compute_dtype), w,
                             (((1,), (0,)), ((), ())),
                             preferred_element_type=jnp.float32)       # (H, N) f32
        s = d1 + zt if use_skip else d1
        # recon[i, j] = sum_h s[h, i] W[h, j]   (== (D1^T + Z) @ W)
        recon = lax.dot_general(s.astype(compute_dtype), w,
                                (((0,), (0,)), ((), ())),
                                preferred_element_type=jnp.float32)    # (N, N) f32
        out_ref[b] = recon.astype(out_ref.dtype)


def encode_kernel(x_ref, w_ref, zt_ref, c_ref, *, bb, compute_dtype):
    """ReEig path, stage 1: emit Z^T (lane-dense, for the skip) and C (for eigh)."""
    w = w_ref[...]                                   # (H, N)
    for b in range(bb):
        x = x_ref[b]                                 # (N, N)
        zt = lax.dot_general(w, x, (((1,), (1,)), ((), ())),
                             preferred_element_type=jnp.float32)       # (H, N)
        zt_ref[b] = zt.astype(zt_ref.dtype)
        c_ref[b] = lax.dot_general(zt.astype(compute_dtype), w,
                                   (((1,), (1,)), ((), ())),
                                   preferred_element_type=jnp.float32
                                   ).astype(c_ref.dtype)               # (H, H)


def decode_rectify_kernel(d_ref, v_ref, zt_ref, w_ref, out_ref, *,
                          bb, eps, use_skip, compute_dtype):
    """ReEig path, stage 2: V diag(max(D,eps)) V^T fused with decode."""
    w = w_ref[...]                                   # (H, N)
    for b in range(bb):
        dcl = jnp.maximum(d_ref[b], eps)             # (1, H)
        v = v_ref[b]                                 # (H, H) f32
        vd = v * dcl                                 # scale columns by clamped eigvals
        # C_rect = (V * D) @ V^T  (f32 for eig-reconstruction accuracy)
        c = lax.dot_general(vd, v, (((1,), (1,)), ((), ())),
                            preferred_element_type=jnp.float32)        # (H, H)
        d1 = lax.dot_general(c.astype(compute_dtype), w,
                             (((1,), (0,)), ((), ())),
                             preferred_element_type=jnp.float32)       # (H, N)
        if use_skip:
            s = d1 + zt_ref[b]
        else:
            s = d1
        recon = lax.dot_general(s.astype(compute_dtype), w,
                                (((0,), (0,)), ((), ())),
                                preferred_element_type=jnp.float32)    # (N, N)
        out_ref[b] = recon.astype(out_ref.dtype)


# ----------------------------- wrapper ------------------------------------ #

def mat_autoencoder_forward(x, W, *, use_reig=True, skip_enc1=True, eps=1e-4,
                            block_b=1, compute_dtype=jnp.bfloat16):
    """x: (B, N, N) float32, W: (H, N) float32 (enc_mat1.weight)."""
    B, N, _ = x.shape
    H = W.shape[0]
    assert B % block_b == 0, "block_b must divide batch"
    nb = B // block_b

    xc = x.astype(compute_dtype)          # halve x DMA bytes (MXU is bf16-native)
    wc = W.astype(compute_dtype)

    cparams = pltpu.CompilerParams(dimension_semantics=("parallel",))

    x_spec = pl.BlockSpec((block_b, N, N), lambda b: (b, 0, 0))
    w_spec = pl.BlockSpec((H, N), lambda b: (0, 0))      # constant -> resident
    out_spec = pl.BlockSpec((block_b, N, N), lambda b: (b, 0, 0))

    if not use_reig:
        return pl.pallas_call(
            functools.partial(fused_forward_kernel, bb=block_b,
                              use_skip=skip_enc1, compute_dtype=compute_dtype),
            out_shape=jax.ShapeDtypeStruct((B, N, N), jnp.float32),
            grid=(nb,),
            in_specs=[x_spec, w_spec],
            out_specs=out_spec,
            compiler_params=cparams,
        )(xc, wc)

    # --- ReEig path: fused encode -> eigh (plain JAX) -> fused rectify+decode ---
    # TODO(synk): symmetric eigendecomposition has no Pallas equivalent; eigh
    # runs in plain JAX between the two fused calls.
    zt, c = pl.pallas_call(
        functools.partial(encode_kernel, bb=block_b, compute_dtype=compute_dtype),
        out_shape=(jax.ShapeDtypeStruct((B, H, N), jnp.float32),
                   jax.ShapeDtypeStruct((B, H, H), jnp.float32)),
        grid=(nb,),
        in_specs=[x_spec, w_spec],
        out_specs=(pl.BlockSpec((block_b, H, N), lambda b: (b, 0, 0)),
                   pl.BlockSpec((block_b, H, H), lambda b: (b, 0, 0))),
        compiler_params=cparams,
    )(xc, wc)

    D, V = jnp.linalg.eigh(c)             # D: (B, H), V: (B, H, H), f32
    D = D.reshape(B, 1, H)

    recon = pl.pallas_call(
        functools.partial(decode_rectify_kernel, bb=block_b, eps=eps,
                          use_skip=skip_enc1, compute_dtype=compute_dtype),
        out_shape=jax.ShapeDtypeStruct((B, N, N), jnp.float32),
        grid=(nb,),
        in_specs=[pl.BlockSpec((block_b, 1, H), lambda b: (b, 0, 0)),
                  pl.BlockSpec((block_b, H, H), lambda b: (b, 0, 0)),
                  pl.BlockSpec((block_b, H, N), lambda b: (b, 0, 0)),
                  w_spec],
        out_specs=out_spec,
        compiler_params=cparams,
    )(D, V, zt, wc)
    return recon


# ----------------------------- reference ----------------------------------- #

def reference_forward(x, W, *, use_reig, skip_enc1, eps):
    """Pure-JAX f32 reference mirroring the torch module."""
    z = jnp.einsum('bnm,hm->bnh', x, W)                       # enc_mat1
    c = jnp.einsum('bni,jn->bij', z, W)                       # enc_mat2 on Z^T
    if use_reig:
        D, V = jnp.linalg.eigh(c)
        D = jnp.maximum(D, eps)
        c = jnp.einsum('bik,bk,bjk->bij', V, D, V)
    d1 = jnp.einsum('bij,jn->bin', c, W)                      # dec_mat1
    zt = jnp.swapaxes(d1, -1, -2)
    if skip_enc1:
        zt = zt + z
    return jnp.einsum('bnh,hm->bnm', zt, W)                   # dec_mat2


# ------------------------------ main --------------------------------------- #

if __name__ == "__main__":
    B, N, H = 4, 16, 8   # batch, input_dim_feat, output_dim_feat

    key = jax.random.PRNGKey(0)
    kx, kw = jax.random.split(key)

    # Symmetric (connectivity-style) inputs, deterministic.
    a = jax.random.normal(kx, (B, N, N), dtype=jnp.float32)
    x = 0.5 * (a + jnp.swapaxes(a, -1, -2))

    # enc_mat1.weight: (output_dim_feat, input_dim_feat).
    W = 0.1 * jax.random.normal(kw, (H, N), dtype=jnp.float32)

    for use_reig in (True, False):
        out = mat_autoencoder_forward(x, W, use_reig=use_reig, skip_enc1=True,
                                      eps=1e-4, block_b=2)
        out = jax.block_until_ready(out)
        assert out.shape == (B, N, N) and out.dtype == jnp.float32
        assert bool(jnp.all(jnp.isfinite(out)))
        ref = reference_forward(x, W, use_reig=use_reig, skip_enc1=True, eps=1e-4)
        assert bool(jnp.allclose(out, ref, rtol=1e-1, atol=1e-1)), \
            float(jnp.abs(out - ref).max())

    print("KERNEL_OK")
</pallas_src>

<mosaic_0001>
module attributes {stable_mosaic.version = 11 : i64} {
  func.func @encode_kernel(%arg0: i32, %arg1: memref<2x16x16xbf16, #tpu.memory_space<vmem>>, %arg2: memref<8x16xbf16, #tpu.memory_space<vmem>>, %arg3: memref<2x8x16xf32, #tpu.memory_space<vmem>>, %arg4: memref<2x8x8xf32, #tpu.memory_space<vmem>>) attributes {dimension_semantics = [#tpu.dimension_semantics<parallel>], iteration_bounds = array<i64: 2>, scalar_prefetch = 0 : i64, scratch_operands = 0 : i64, tpu.core_type = #tpu.core_type<tc>, window_params = [{transform_indices = @transform_0, window_bounds = array<i64: 2, 16, 16>}, {pipeline_mode = #tpu.pipeline_mode<synchronous>, transform_indices = @transform_1, window_bounds = array<i64: 8, 16>}, {transform_indices = @transform_2, window_bounds = array<i64: 2, 8, 16>}, {transform_indices = @transform_3, window_bounds = array<i64: 2, 8, 8>}]} {
    %c0 = arith.constant 0 : index
    %c0_0 = arith.constant 0 : index
    %0 = vector.load %arg2[%c0, %c0_0] : memref<8x16xbf16, #tpu.memory_space<vmem>>, vector<8x16xbf16>
    %c0_1 = arith.constant 0 : index
    %c0_2 = arith.constant 0 : index
    %c0_3 = arith.constant 0 : index
    %1 = vector.load %arg1[%c0_1, %c0_2, %c0_3] : memref<2x16x16xbf16, #tpu.memory_space<vmem>>, vector<1x16x16xbf16>
    %2 = vector.shape_cast %1 : vector<1x16x16xbf16> to vector<16x16xbf16>
    %cst = arith.constant dense<0.000000e+00> : vector<8x16xf32>
    %3 = tpu.matmul %0, %2, %cst {dimension_numbers = #tpu.dot_dimension_numbers<[1], [1], [0], [0], [0, 0, 1, 0], [], []>} : vector<8x16xbf16>, vector<16x16xbf16>, vector<8x16xf32> -> vector<8x16xf32>
    %c0_4 = arith.constant 0 : index
    %c0_5 = arith.constant 0 : index
    %c0_6 = arith.constant 0 : index
    %4 = vector.load %arg3[%c0_4, %c0_5, %c0_6] : memref<2x8x16xf32, #tpu.memory_space<vmem>>, vector<1x8x16xf32>
    %5 = vector.shape_cast %4 : vector<1x8x16xf32> to vector<8x16xf32>
    %6 = vector.shape_cast %3 : vector<8x16xf32> to vector<1x8x16xf32>
    tpu.vector_store %arg3[%c0_4, %c0_5, %c0_6], %6 {strides = array<i32>} : memref<2x8x16xf32, #tpu.memory_space<vmem>>, vector<1x8x16xf32>,
    %7 = arith.truncf %3 : vector<8x16xf32> to vector<8x16xbf16>
    %cst_7 = arith.constant dense<0.000000e+00> : vector<8x8xf32>
    %8 = tpu.matmul %7, %0, %cst_7 {dimension_numbers = #tpu.dot_dimension_numbers<[1], [1], [0], [0], [0, 0, 1, 0], [], []>} : vector<8x16xbf16>, vector<8x16xbf16>, vector<8x8xf32> -> vector<8x8xf32>
    %c0_8 = arith.constant 0 : index
    %c0_9 = arith.constant 0 : index
    %c0_10 = arith.constant 0 : index
    %9 = vector.load %arg4[%c0_8, %c0_9, %c0_10] : memref<2x8x8xf32, #tpu.memory_space<vmem>>, vector<1x8x8xf32>
    %10 = vector.shape_cast %9 : vector<1x8x8xf32> to vector<8x8xf32>
    %11 = vector.shape_cast %8 : vector<8x8xf32> to vector<1x8x8xf32>
    tpu.vector_store %arg4[%c0_8, %c0_9, %c0_10], %11 {strides = array<i32>} : memref<2x8x8xf32, #tpu.memory_space<vmem>>, vector<1x8x8xf32>,
    %c1 = arith.constant 1 : index
    %c0_11 = arith.constant 0 : index
    %c0_12 = arith.constant 0 : index
    %12 = vector.load %arg1[%c1, %c0_11, %c0_12] : memref<2x16x16xbf16, #tpu.memory_space<vmem>>, vector<1x16x16xbf16>
    %13 = vector.shape_cast %12 : vector<1x16x16xbf16> to vector<16x16xbf16>
    %cst_13 = arith.constant dense<0.000000e+00> : vector<8x16xf32>
    %14 = tpu.matmul %0, %13, %cst_13 {dimension_numbers = #tpu.dot_dimension_numbers<[1], [1], [0], [0], [0, 0, 1, 0], [], []>} : vector<8x16xbf16>, vector<16x16xbf16>, vector<8x16xf32> -> vector<8x16xf32>
    %c1_14 = arith.constant 1 : index
    %c0_15 = arith.constant 0 : index
    %c0_16 = arith.constant 0 : index
    %15 = vector.load %arg3[%c1_14, %c0_15, %c0_16] : memref<2x8x16xf32, #tpu.memory_space<vmem>>, vector<1x8x16xf32>
    %16 = vector.shape_cast %15 : vector<1x8x16xf32> to vector<8x16xf32>
    %17 = vector.shape_cast %14 : vector<8x16xf32> to vector<1x8x16xf32>
    tpu.vector_store %arg3[%c1_14, %c0_15, %c0_16], %17 {strides = array<i32>} : memref<2x8x16xf32, #tpu.memory_space<vmem>>, vector<1x8x16xf32>,
    %18 = arith.truncf %14 : vector<8x16xf32> to vector<8x16xbf16>
    %cst_17 = arith.constant dense<0.000000e+00> : vector<8x8xf32>
    %19 = tpu.matmul %18, %0, %cst_17 {dimension_numbers = #tpu.dot_dimension_numbers<[1], [1], [0], [0], [0, 0, 1, 0], [], []>} : vector<8x16xbf16>, vector<8x16xbf16>, vector<8x8xf32> -> vector<8x8xf32>
    %c1_18 = arith.constant 1 : index
    %c0_19 = arith.constant 0 : index
    %c0_20 = arith.constant 0 : index
    %20 = vector.load %arg4[%c1_18, %c0_19, %c0_20] : memref<2x8x8xf32, #tpu.memory_space<vmem>>, vector<1x8x8xf32>
    %21 = vector.shape_cast %20 : vector<1x8x8xf32> to vector<8x8xf32>
    %22 = vector.shape_cast %19 : vector<8x8xf32> to vector<1x8x8xf32>
    tpu.vector_store %arg4[%c1_18, %c0_19, %c0_20], %22 {strides = array<i32>} : memref<2x8x8xf32, #tpu.memory_space<vmem>>, vector<1x8x8xf32>,
    return
  }
  func.func @transform_0(%arg0: i32) -> (i32, i32, i32) {
    %c0_i32 = arith.constant 0 : i32
    %c0_i32_0 = arith.constant 0 : i32
    %c0_i32_1 = arith.constant 0 : i32
    return %arg0, %c0_i32, %c0_i32_0 : i32, i32, i32
  }
  func.func @transform_1(%arg0: i32) -> (i32, i32) {
    %c0_i32 = arith.constant 0 : i32
    %c0_i32_0 = arith.constant 0 : i32
    %c0_i32_1 = arith.constant 0 : i32
    return %c0_i32, %c0_i32_0 : i32, i32
  }
  func.func @transform_2(%arg0: i32) -> (i32, i32, i32) {
    %c0_i32 = arith.constant 0 : i32
    %c0_i32_0 = arith.constant 0 : i32
    %c0_i32_1 = arith.constant 0 : i32
    return %arg0, %c0_i32, %c0_i32_0 : i32, i32, i32
  }
  func.func @transform_3(%arg0: i32) -> (i32, i32, i32) {
    %c0_i32 = arith.constant 0 : i32
    %c0_i32_0 = arith.constant 0 : i32
    %c0_i32_1 = arith.constant 0 : i32
    return %arg0, %c0_i32, %c0_i32_0 : i32, i32, i32
  }
}

</mosaic_0001>

<bundles_post_ra>
// kernel: tpu_custom_call.1
= control target key start
LH: loop header
LB: loop body
LE: loop exit
PB: predicated region body
PF: predicated region fallthrough
CT: control target
= control target key end

     0   :  { %9 = vsyncpa [#allocation3], 0  ;;  %s1155_s0 = inlined_call_operand.hbm [shape: bf16[4,16,16], index: 0, kind: input, shape index: {}]   ;;  %s1156_s1 = inlined_call_operand.hbm [shape: bf16[8,16], index: 1, kind: input, shape index: {}]   ;;  %s1157_s2 = inlined_call_operand.hbm [shape: f32[4,8,16], index: 2, kind: output, shape index: {0}]   ;;  %s1158_s3 = inlined_call_operand.hbm [shape: f32[4,8,8], index: 3, kind: output, shape index: {1}]  }
   0x1   :  { %11 = vsyncpa [#allocation3 + $0x1], 0 }
   0x2   :  { %12 = vsyncpa [#allocation6], 0 }
   0x3   :  { %13 = vsyncpa [#allocation4], 0 }
   0x4   :  { %15 = vsyncpa [#allocation4 + $0x1], 0 }
   0x5   :  { %16 = vsyncpa [#allocation9], 0 }
   0x6   :  { %18 = vsyncpa [#allocation9 + $0x1], 0  ;;  %s898_s12 = smov 0   ;;  %s900_s13 = smov 0  }
   0x7   :  { %s902_s14 = smov 0   ;;  %s904_s15 = smov 0  }
   0x8 LB: > { %s919_s16 = sadd.s32 4294967295, %s866_s15   ;;  %s569_s17 = sadd.s32 4294967294, %s866_s15   ;;  %s866_s15 = sphi %s904_s15, %s1183_s15   ;;  %s862_s14 = sphi %s902_s14, %s1182_s14   ;;  %s858_s13 = sphi %s900_s13, %s1181_s13   ;;  %s854_s12 = sphi %s898_s12, %s1180_s12  }
   0x9   : > { %s923_s18 = sadd.s32 1, %s866_s15   ;;  %s31_s19 = sadd.s32 1, %s862_s14 }
   0xa   : > { %s28_s20 = ssub.s32 %s866_s15, %s923_s18  ;;  %p38_p0 = scmp.ne.s32.totalorder %s862_s14, %s858_s13 }
   0xb   : > { %p29_p1 = scmp.eq.s32.totalorder %s28_s20, 0  ;;  %p39_p2 = scmp.eq.s32.totalorder %s866_s15, 0 }
   0xc   : > { %p44_p3 = scmp.ne.s32.totalorder %s858_s13, %s854_s12  ;;  %p1159_p4 = scmp.eq.s32.totalorder %s919_s16, 0 }
   0xd   : > { %s935_s21 = scalar_select %p29_p1, %s862_s14, %s31_s19  }
   0xe   : > { %p937_p5 = por %p39_p2, %p38_p0  ;;  %p943_p6 = por %p1159_p4, %p44_p3 }
   0xf   : > { %p89_p7 = scmp.eq.s32.totalorder %s919_s16, 1  ;;  %p95_p8 = scmp.eq.s32.totalorder %s569_s17, 1 }
  0x10   : > { %s1165_s23 = scalar_select %p943_p6, 1, 0 }
  0x11   : > { %p570_p9 = scmp.ge.s32.totalorder %s866_s15, 1  ;;  %p128_p10 = scmp.lt.s32.totalorder %s866_s15, 3 }
  0x12   : > { %p950_p11 = por %p89_p7, %p38_p0  ;;  %p954_p12 = por %p95_p8, %p44_p3 }
  0x13   : > { %p958_p13 = pnand %p570_p9, %p128_p10  ;;  %s868_s27 = smov [#allocation5]  }
  0x14   : > { %s1166_s24 = scalar_select %p950_p11, 1, 0 }
  0x15   : > { %s1167_s25 = scalar_select %p954_p12, 1, 0 }
  0x16   : > { %s1168_s26 = scalar_select %p958_p13, 1, 0 }
  0x17   : > { %p646_p2 = pneg %p958_p13  ;;  %s141_s28 = sshll.u32 %s868_s27, 4  ;;  %s142_s28 = int_to_ptr.vmem [resolvable:$true] %s141_s28 }
  0x18   : > { %p662_p4 = scmp.lt.s32.totalorder %s866_s15, 2  ;;  %p1169_p0 = scmp.eq.s32.totalorder %s919_s16, 0 }
  0x19   : > { %s152_s30 = sand.u32 1, %s862_s14   ;;  %s706_s8 = scalar_lea.hbm %s1156_s1, 64 }
  0x1a   : > { %p968_p7 = pnand %p646_p2, %p1169_p0  ;;  %p975_p3 = pnand %p662_p4, %p937_p5 }
  0x1b   : > { %s573_s5 = sshll.u32 %s152_s30, 4  ;;  %p707_p8 = scmp.ne.s32.totalorder %s1156_s1, %s706_s8 }
  0x1c   : > { %s1171_s4 = scalar_select %p975_p3, 1, 0 }
  0x1d   : > { %p708_p9 = pneg %p968_p7  ;;  %p713_p4 = scmp.lt.u32.totalorder %s706_s8, %s1156_s1 }
  0x1f   : > { %p709_p10 = pnand %p708_p9, %p707_p8 }
  0x21   : > { %p710_p2 = pneg %p709_p10 }
  0x23   : > { %p715_p5 = pnand %p713_p4, %p710_p2 }
  0x25   : > { %718 = shalt.err (!%p715_p5)
}
  0x26   : > { %s719_s19 = scalar_lea.vmem %s142_s28, 64  ;;  %p727_p11 = scmp.lt.s32.totalorder %s142_s28, %s142_s28 }
  0x27   : > { %p720_p0 = scmp.ne.s32.totalorder %s142_s28, %s719_s19  ;;  %p728_p6 = scmp.lt.s32.totalorder %s719_s19, %s719_s19 }
  0x29   : > { %p722_p1 = pnand %p720_p0, %p708_p9  ;;  %p729_p13 = por %p728_p6, %p727_p11 }
  0x2b   : > { %p723_p12 = pneg %p722_p1 }
  0x2d   : > { %p730_p3 = pnand %p729_p13, %p723_p12 }
  0x2f   : > { %733 = shalt.err (!%p730_p3)
}
  0x30   : > { %649 = dma.hbm_to_vmem [thread:$0]  (!%p968_p7), %s1156_s1, 64, %s142_s28, [#allocation6]  }
  0x31   : > { %s601_s27 = sshll.u32 %s866_s15, 8  ;;  %s156_s6 = scalar_lea.vmem [#allocation2], %s573_s5 }
  0x32   : > { %s164_s7 = sshll.u32 %s156_s6, 4  ;;  %s999_s10 = scalar_lea.hbm %s1155_s0, %s601_s27  ;;  %s1001_s7 = int_to_ptr.vmem [resolvable:$true] %s164_s7 }
  0x33   : > { %s1003_s29 = scalar_lea.sflag [#allocation3], %s152_s30  ;;  %s734_s11 = scalar_lea.hbm %s999_s10, 256 }
  0x34   : > { %p735_p6 = scmp.ne.s32.totalorder %s999_s10, %s734_s11  ;;  %p1172_p11 = scmp.ne.s32.totalorder %s1171_s4, 0 }
  0x35   : > { %s739_s17 = scalar_lea.hbm %s1155_s0, 512  ;;  %p740_p7 = scmp.lt.u32.totalorder %s999_s10, %s1155_s0 }
  0x36   : > { %p736_p12 = pneg %p1172_p11  ;;  %p741_p3 = scmp.lt.u32.totalorder %s739_s17, %s734_s11 }
  0x37   : > { %p743_p9 = scmp.lt.u32.totalorder %s734_s11, %s999_s10 }
  0x38   : > { %p737_p13 = pnand %p736_p12, %p735_p6  ;;  %p742_p8 = por %p741_p3, %p740_p7 }
  0x3a   : > { %p738_p1 = pneg %p737_p13  ;;  %p744_p10 = por %p743_p9, %p742_p8 }
  0x3c   : > { %p745_p2 = pnand %p744_p10, %p738_p1 }
  0x3e   : > { %748 = shalt.err (!%p745_p2)
}
  0x3f   : > { %s749_s30 = scalar_lea.vmem %s1001_s7, 256  ;;  %s869_s22 = smov [#allocation2]  }
  0x40   : > { %p750_p4 = scmp.ne.s32.totalorder %s1001_s7, %s749_s30  ;;  %s754_s27 = sshll.u32 %s869_s22, 4  ;;  %s755_s27 = int_to_ptr.vmem [resolvable:$false] %s754_s27 }
  0x41   : > { %s756_s6 = scalar_lea.vmem %s755_s27, 512  ;;  %p757_p6 = scmp.lt.s32.totalorder %s1001_s7, %s755_s27 }
  0x42   : > { %p752_p5 = pnand %p750_p4, %p736_p12  ;;  %p758_p13 = scmp.lt.s32.totalorder %s756_s6, %s749_s30 }
  0x44   : > { %p753_p0 = pneg %p752_p5  ;;  %p759_p7 = por %p758_p13, %p757_p6 }
  0x46   : > { %p760_p3 = pnand %p759_p7, %p753_p0 }
  0x48   : > { %763 = shalt.err (!%p760_p3)
}
  0x49   : > { %s870_s8 = smov 64   ;;  %s871_s9 = smov 4  }
  0x4a   : > { %653 = dma.hbm_to_vmem [thread:$0]  (!%p1172_p11), %s999_s10, 256, %s1001_s7, %s1003_s29, %s870_s8, %s870_s8, %s871_s9  }
  0x4b   : > { %p1173_p12 = scmp.ne.s32.totalorder %s1168_s26, 0 }
  0x4c   : > { %s1034_s11 = sand.u32 (!%p1173_p12), 1, %s858_s13   ;;  %p1174_p1 = scmp.ne.s32.totalorder (!%p1173_p12), %s1165_s23, 0 }
  0x4d   : > { %176 = sbr.rel (%p1173_p12) target bundleno = 547 (0x223), region = 28  ;;  %s1037_s28 = sshll.u32 (!%p1173_p12), %s1034_s11, 4 }
  0x4e   : > { %s179_s5 = scalar_lea.sflag (!%p1173_p12), [#allocation3], %s1034_s11  ;;  %s182_s17 = scalar_lea.vmem (!%p1173_p12), [#allocation2], %s1037_s28 }
  0x54   : > { %837 = dma.done.wait (%p1174_p1), %s179_s5, 256  }
  0x55   : > { %839 = vsyncadd (%p1174_p1), %s179_s5, 4294967040  ;;  %p1175_p11 = scmp.eq.s32.totalorder %s919_s16, 0 }
  0x57   : > { %841 = dma.done.wait (%p1175_p11), [#allocation6], 64   ;;  %p1176_p8 = pmov %p1175_p11 }
  0x58   : > { %v872_v0 = vmov 0.0   ;;  %vm873_vm0 = vmmov 0   ;;  %vm226_vm1 = vcmask 130048   ;;  %v704_v1 = vld [vmem:[%s182_s17] sm:$0xff]   ;;  %v705_v5 = vld [vmem:[%s182_s17 + $0x8] sm:$0xff]   ;;  %s206_s23 = scalar_lea.vmem [#allocation7], %s1037_s28 }
  0x59   : > { %843 = vsyncadd (%p1176_p8), [#allocation6], 4294967232  ;;  %612 = vmatprep.subr.bf16.mxu0 %v872_v0  ;;  %614 = vmatprep.mubr.msk.bf16.mxu0 %vm873_vm0, %v872_v0  ;;  %v218_v2 = vld [vmem:[#allocation5] sm:$0xf]  ;;  %v231_v3 = vsel %vm226_vm1, %v704_v1, 0  ;;  %v329_v6 = vsel %vm226_vm1, %v705_v5, 0 }
  0x5a   : > { %618 = vmatprep.subr.bf16.mxu1 %v872_v0  ;;  %620 = vmatprep.mubr.msk.bf16.mxu1 %vm873_vm0, %v872_v0  ;;  %v228_v4 = vsel %vm226_vm1, %v218_v2, 0  ;;  %s438_s26 = sshll.u32 %s206_s23, 4  ;;  %s602_s4 = sshll.u32 %s919_s16, 8  ;;  %s1063_s26 = int_to_ptr.vmem [resolvable:$true] %s438_s26 }
  0x5b   : > { %613 = vmatpush3.bf16.xpose.msra.mxu0 %v231_v3  ;;  %619 = vmatpush3.bf16.xpose.msra.mxu1 %v228_v4  ;;  %s1071_s29 = scalar_lea.hbm %s1157_s2, %s602_s4  ;;  %s420_s19 = scalar_lea.sflag [#allocation4], %s1034_s11 }
  0x5c   : > { %624 = vmatprep.subr.bf16.mxu0 %v872_v0  ;;  %630 = vmatprep.subr.bf16.mxu1 %v872_v0  ;;  %s764_s20 = scalar_lea.vmem %s1063_s26, 256  ;;  %p1177_p10 = scmp.ne.s32.totalorder %s1166_s24, 0 }
  0x5d   : > { %p765_p9 = scmp.ne.s32.totalorder %s1063_s26, %s764_s20  ;;  %s874_s30 = smov [#allocation7]  }
  0x5e   : > { %s768_s22 = sshll.u32 %s874_s30, 4  ;;  %s769_s22 = int_to_ptr.vmem [resolvable:$false] %s768_s22 }
  0x5f   : > { %p766_p2 = pnand %p765_p9, %p1177_p10  ;;  %s770_s27 = scalar_lea.vmem %s769_s22, 512 }
  0x60   : > { %p771_p5 = scmp.lt.s32.totalorder %s1063_s26, %s769_s22  ;;  %p772_p0 = scmp.lt.s32.totalorder %s770_s27, %s764_s20 }
  0x61   : > { %p767_p4 = pneg %p766_p2 }
  0x62   : > { %615 = vmatmul.mubr.msk.bf16.vlgmr.msra.gmra.mrb[0].mxu0 %vm226_vm1, %v218_v2  ;;  %p773_p6 = por %p772_p0, %p771_p5 }
  0x63   : > { %625 = vmatpush3.bf16.xpose.msra.mxu0 %v329_v6  ;;  %626 = vmatprep.mubr.msk.bf16.mxu0 %vm873_vm0, %v872_v0 }
  0x64   : > { %p774_p13 = pnand %p773_p6, %p767_p4 }
  0x6a   : > { %627 = vmatmul.mubr.msk.bf16.vlgmr.msra.gmra.mrb[4].mxu0 %vm226_vm1, %v218_v2 }
 0x135   : > { %v267_v7 = vpop.f32.mrb[0].mxu0 }
 0x136   : > { %273 = vst.msk [vmem:[%s206_s23] sm:$0xff] %vm226_vm1, %v267_v7  ;;  %v274_v8 = vpack.c.bf16 %v267_v7, %v267_v7  ;;  %v616_v9 = vpop.f32.mrb[1].mxu0 }
 0x137   : > { %v270_v10 = vpop.f32.mrb[2].mxu0 }
 0x138   : > { %v617_v11 = vpop.f32.mrb[3].mxu0  ;;  %621 = vmatmul.mubr.msk.bf16.vlgmr.msra.gmra.mrb[0].mxu1 %vm226_vm1, %v274_v8 }
 0x139   : > { %631 = vmatpush3.bf16.xpose.msra.mxu1 %v228_v4  ;;  %632 = vmatprep.mubr.msk.bf16.mxu1 %vm873_vm0, %v872_v0 }
 0x13d   : > { %v365_v12 = vpop.f32.mrb[4].mxu0 }
 0x13e   : > { %589 = vst.msk [vmem:[%s206_s23 + $0x8] sm:$0xff] %vm226_vm1, %v365_v12  ;;  %v373_v13 = vpack.c.bf16 %v365_v12, %v365_v12  ;;  %v628_v14 = vpop.f32.mrb[5].mxu0 }
 0x13f   : > { %v368_v15 = vpop.f32.mrb[6].mxu0 }
 0x140   : > { %v629_v16 = vpop.f32.mrb[7].mxu0  ;;  %633 = vmatmul.mubr.msk.bf16.vlgmr.msra.gmra.mrb[4].mxu1 %vm226_vm1, %v373_v13 }
 0x141   : > { %777 = shalt.err (!%p774_p13)
}
 0x142   : > { %s778_s6 = scalar_lea.hbm %s1071_s29, 256  ;;  %s782_s5 = scalar_lea.hbm %s1157_s2, 512 }
 0x143   : > { %p779_p7 = scmp.ne.s32.totalorder %s1071_s29, %s778_s6  ;;  %p783_p1 = scmp.lt.u32.totalorder %s1071_s29, %s1157_s2 }
 0x144   : > { %p784_p11 = scmp.lt.u32.totalorder %s782_s5, %s778_s6  ;;  %p786_p9 = scmp.lt.u32.totalorder %s778_s6, %s1071_s29 }
 0x145   : > { %p780_p3 = pnand %p779_p7, %p1177_p10 }
 0x146   : > { %p785_p8 = por %p784_p11, %p783_p1 }
 0x147   : > { %p781_p12 = pneg %p780_p3 }
 0x148   : > { %p787_p2 = por %p786_p9, %p785_p8 }
 0x14a   : > { %p788_p4 = pnand %p787_p2, %p781_p12 }
 0x14c   : > { %791 = shalt.err (!%p788_p4)
}
 0x14d   : > { %s875_s7 = smov 128   ;;  %s876_s10 = smov 8   ;;  %vm318_vm2 = vcmask 64512  }
 0x14e   : > { %642 = dma.vmem_to_hbm [thread:$0]  (%p1177_p10), %s1063_s26, 256, %s1071_s29, %s420_s19, %s875_s7, %s875_s7, %s876_s10  }
 0x14f   : > { %s213_s20 = scalar_lea.vmem [#allocation8], %s1037_s28  ;;  %s1108_s6 = scalar_lea.hbm %s1158_s3, %s602_s4 }
 0x150   : > { %s454_s30 = sshll.u32 %s213_s20, 4  ;;  %s425_s28 = scalar_lea.sflag [#allocation9], %s1034_s11  ;;  %s1101_s30 = int_to_ptr.vmem [resolvable:$true] %s454_s30 }
 0x151   : > { %s792_s26 = scalar_lea.vmem %s1101_s30, 256  ;;  %s877_s29 = smov [#allocation8]  }
 0x152   : > { %p793_p5 = scmp.ne.s32.totalorder %s1101_s30, %s792_s26  ;;  %s796_s16 = sshll.u32 %s877_s29, 4  ;;  %s797_s16 = int_to_ptr.vmem [resolvable:$false] %s796_s16 }
 0x153   : > { %s798_s19 = scalar_lea.vmem %s797_s16, 512  ;;  %p799_p13 = scmp.lt.s32.totalorder %s1101_s30, %s797_s16 }
 0x154   : > { %p794_p0 = pnand %p793_p5, %p1177_p10  ;;  %p800_p7 = scmp.lt.s32.totalorder %s798_s19, %s792_s26 }
 0x156   : > { %p795_p6 = pneg %p794_p0  ;;  %p801_p3 = por %p800_p7, %p799_p13 }
 0x158   : > { %p802_p12 = pnand %p801_p3, %p795_p6 }
 0x20b   : > { %v312_v17 = vpop.f32.mrb[0].mxu1 }
 0x20c   : > { %319 = vst.msk [vmem:[%s213_s20] sm:$0xff] %vm318_vm2, %v312_v17  ;;  %v622_v18 = vpop.f32.mrb[1].mxu1 }
 0x20d   : > { %v315_v19 = vpop.f32.mrb[2].mxu1 }
 0x20e   : > { %v623_v20 = vpop.f32.mrb[3].mxu1 }
 0x213   : > { %v411_v21 = vpop.f32.mrb[4].mxu1 }
 0x214   : > { %591 = vst.msk [vmem:[%s213_s20 + $0x8] sm:$0xff] %vm318_vm2, %v411_v21  ;;  %v634_v22 = vpop.f32.mrb[5].mxu1 }
 0x215   : > { %v414_v23 = vpop.f32.mrb[6].mxu1 }
 0x216   : > { %805 = shalt.err (!%p802_p12)
}
 0x217   : > { %s806_s4 = scalar_lea.hbm %s1108_s6, 256  ;;  %s810_s5 = scalar_lea.hbm %s1158_s3, 512 }
 0x218   : > { %p807_p1 = scmp.ne.s32.totalorder %s1108_s6, %s806_s4  ;;  %p811_p9 = scmp.lt.u32.totalorder %s1108_s6, %s1158_s3 }
 0x219   : > { %p812_p2 = scmp.lt.u32.totalorder %s810_s5, %s806_s4  ;;  %p814_p5 = scmp.lt.u32.totalorder %s806_s4, %s1108_s6 }
 0x21a   : > { %p808_p11 = pnand %p807_p1, %p1177_p10 }
 0x21b   : > { %p813_p4 = por %p812_p2, %p811_p9 }
 0x21c   : > { %p809_p8 = pneg %p808_p11 }
 0x21d   : > { %p815_p0 = por %p814_p5, %p813_p4 }
 0x21f   : > { %p816_p6 = pnand %p815_p0, %p809_p8 }
 0x221   : > { %819 = shalt.err (!%p816_p6)
}
 0x222   : > { %643 = dma.vmem_to_hbm [thread:$0]  (%p1177_p10), %s1101_s30, 256, %s1108_s6, %s425_s28, %s875_s7, %s875_s7, %s876_s10   ;;  %v635_v24 = vpop.f32.mrb[7].mxu1 }
 0x223 PF: > { %s469_s20 = sand.u32 1, %s854_s12   ;;  %p1178_p13 = scmp.ne.s32.totalorder %s1167_s25, 0 }
 0x224   : > { %p1179_p7 = scmp.ge.s32.totalorder %s866_s15, 2  ;;  %s470_s22 = scalar_lea.sflag [#allocation4], %s469_s20 }
 0x226   : > { %p655_p3 = pnand %p1179_p7, %p1178_p13 }
 0x228   : > { %845 = dma.done.wait (!%p655_p3), %s470_s22, 256  }
 0x229   : > { %847 = vsyncadd (!%p655_p3), %s470_s22, 4294967040  ;;  %s479_s24 = scalar_lea.sflag [#allocation9], %s469_s20 }
 0x22a   : > { %849 = dma.done.wait (!%p655_p3), %s479_s24, 256  }
 0x22b   : > { %851 = vsyncadd (!%p655_p3), %s479_s24, 4294967040  ;;  %p21_p10 = scmp.ge.s32.totalorder %s923_s18, 4   ;;  %s1180_s12 = smov %s858_s13 }
 0x22c   : > { %s1181_s13 = smov %s862_s14  ;;  %s1182_s14 = smov %s935_s21 }
 0x22d   : > { %s1183_s15 = smov %s923_s18  ;;  %23 = sbr.rel (!%p21_p10) target bundleno = 8 (0x8), region = 97 }
 0x234   :  { %484 = vsyncpa [#allocation3], 1 }
 0x235   :  { %486 = vsyncpa [#allocation3 + $0x1], 1 }
 0x236   :  { %487 = vsyncpa [#allocation6], 1 }
 0x237   :  { %488 = vsyncpa [#allocation4], 1 }
 0x238   :  { %490 = vsyncpa [#allocation4 + $0x1], 1 }
 0x239   :  { %491 = vsyncpa [#allocation9], 1 }
 0x23a   :  { %493 = vsyncpa [#allocation9 + $0x1], 1 }

</bundles_post_ra>
